<compile_context>
chip_gen: v6e
topology: v6e:2x2x1
jax: 0.10.0
libtpu: 0.0.40
codegen_flags: <defaults>
</compile_context>

<pallas_src>
import functools

import jax
import jax.numpy as jnp
from jax.experimental import pallas as pl
from jax.experimental.pallas import tpu as pltpu

_VMEM_LIMIT = 48 * 1024 * 1024   # <= ~48 MiB: safe on v7x (64 MiB physical) and v5e/v6e
_MAX_TM = 1024                   # target-row tile for the aggregation stage
_MAX_TK = 1024                   # source-row (reduction) tile, multiple of 128
_MAX_XFORM_ROWS = 2048           # stage-1 (feature transform) row-tile upper bound
_ROW_MULT = 32                   # int8 A packs (32,128) tiles; also fine for bf16/f32


def _round_up(n, m):
    return ((n + m - 1) // m) * m


def _pad_feature_dim(d):
    # 128 lanes minimum; multiples of 256 when wider so the v6e/v7x 2x256^2 MXU
    # runs at full width (v5e's 4x128^2 is already full at 128).
    return 128 if d <= 128 else _round_up(d, 256)


def _tile_and_pad(n, max_tile, mult, prefer_split=False):
    """Pick a tile (multiple of `mult`, <= max_tile) and the padded extent."""
    tile = min(max_tile, _round_up(n, mult))
    n_pad = _round_up(n, tile)
    if prefer_split and n_pad == tile and n > 8 * mult:
        # keep >= 2 row blocks so the "parallel" axis can shard across v7x's 2 TCs
        tile = _round_up((tile + 1) // 2, mult)
        n_pad = _round_up(n, tile)
    return tile, n_pad


def _grow_tile(base, n_pad, max_tile):
    """Largest multiple-of-`base` tile <= max_tile that divides n_pad."""
    t = base
    while 2 * t <= max_tile and n_pad % (2 * t) == 0:
        t *= 2
    return t


def _pad2d(a, rows, cols):
    r, c = a.shape
    return jnp.pad(a, ((0, rows - r), (0, cols - c)))


# --------------------------------------------------------------------------
# Stage 1: feature transform  o = x @ W (+ b)   (bf16 in, f32 MXU acc)
# --------------------------------------------------------------------------
def _xform_kernel(x_ref, w_ref, b_ref, o_ref):
    h = jnp.dot(x_ref[...], w_ref[...], preferred_element_type=jnp.float32)
    o_ref[...] = (h + b_ref[...]).astype(o_ref.dtype)


def _feature_transform(x_p, w_p, b_p, row_tile, out_dtype):
    n_pad, din_pad = x_p.shape
    d_pad = w_p.shape[1]
    out_bytes = n_pad * d_pad * jnp.dtype(out_dtype).itemsize
    nbytes = 2 * (x_p.size + w_p.size) + 4 * b_p.size + out_bytes
    return pl.pallas_call(
        _xform_kernel,
        out_shape=jax.ShapeDtypeStruct((n_pad, d_pad), out_dtype),
        grid=(n_pad // row_tile,),
        in_specs=[
            pl.BlockSpec((row_tile, din_pad), lambda i: (i, 0)),
            pl.BlockSpec((din_pad, d_pad), lambda i: (0, 0)),   # W stays resident
            pl.BlockSpec((1, d_pad), lambda i: (0, 0)),
        ],
        out_specs=pl.BlockSpec((row_tile, d_pad), lambda i: (i, 0)),
        compiler_params=pltpu.CompilerParams(
            dimension_semantics=("parallel",),
            vmem_limit_bytes=_VMEM_LIMIT),
        cost_estimate=pl.CostEstimate(
            flops=int(2 * n_pad * din_pad * d_pad),
            transcendentals=0,
            bytes_accessed=int(nbytes)),
    )(x_p, w_p, b_p)


# --------------------------------------------------------------------------
# Stage 2: tiled aggregate + combine + activation
#   acc[i,:] = sum_k A[i,k] @ xw[k,:]        (K-axis accumulator, pl.when)
#   out      = act(acc * (1/deg) + xtw)      (xtw = x_target @ W_r + b, precomputed)
# --------------------------------------------------------------------------
def _agg_kernel(a_ref, xw_ref, xtw_ref, inv_ref, o_ref, acc_ref, *,
                activation, valid_cols):
    k = pl.program_id(1)

    @pl.when(k == 0)
    def _():
        acc_ref[...] = jnp.zeros_like(acc_ref)

    # int8 edge counts widened to bf16 (VPU filler in slack slots), MXU dot, f32 acc
    a = a_ref[...].astype(jnp.bfloat16)
    acc_ref[...] += jnp.dot(a, xw_ref[...], preferred_element_type=jnp.float32)

    @pl.when(k == pl.num_programs(1) - 1)
    def _():
        h = acc_ref[...] * inv_ref[...] + xtw_ref[...]        # mean scale + lin_r + b
        if activation == "relu":
            h = jnp.maximum(h, 0.0)
        elif activation == "log_softmax":
            # mask lane-padding columns out of the row-wise reduction
            col = jax.lax.broadcasted_iota(jnp.int32, h.shape, 1)
            h = jnp.where(col < valid_cols, h, jnp.float32(-1e30))
            m = jnp.max(h, axis=-1, keepdims=True)
            s = h - m
            lse = jnp.log(jnp.sum(jnp.exp(s), axis=-1, keepdims=True))
            h = s - lse
        o_ref[...] = h.astype(o_ref.dtype)


def sage_layer(edge_index, n_src, n_tgt, x, x_target, w_l, w_r, b, activation):
    """One SAGEConv layer (+ relu / log_softmax), fused Pallas TPU kernels."""
    din = x.shape[1]
    dout = w_l.shape[1]

    tm, nt_pad = _tile_and_pad(n_tgt, _MAX_TM, _ROW_MULT, prefer_split=True)
    tk, ns_pad = _tile_and_pad(n_src, _MAX_TK, 128)
    din_pad = _round_up(din, 128)
    d_pad = _pad_feature_dim(dout)

    # --- adjacency: built directly at padded shape in one scatter, int8 storage ---
    # TODO(synk): replace dense A with a scalar-prefetched CSR gather + segment-mean.
    src, dst = edge_index[0], edge_index[1]
    counts = jnp.zeros((nt_pad, ns_pad), jnp.int32).at[dst, src].add(1)
    deg = jnp.sum(counts, axis=1, keepdims=True).astype(jnp.float32)
    inv_p = jnp.where(deg > 0, 1.0 / jnp.maximum(deg, 1.0), 0.0)   # (nt_pad, 1) f32
    # sampled-subgraph edge multiplicities are tiny; clamp so int8 storage is exact
    a_p = jnp.clip(counts, 0, 127).astype(jnp.int8)

    x_p = _pad2d(x, ns_pad, din_pad).astype(jnp.bfloat16)
    xt_p = _pad2d(x_target, nt_pad, din_pad).astype(jnp.bfloat16)
    wl_p = _pad2d(w_l, din_pad, d_pad).astype(jnp.bfloat16)
    wr_p = _pad2d(w_r, din_pad, d_pad).astype(jnp.bfloat16)
    b_p = _pad2d(b.reshape(1, dout).astype(jnp.float32), 1, d_pad)
    b0_p = jnp.zeros((1, d_pad), jnp.float32)

    # --- stage 1: reordered contraction, both feature transforms up front ---
    tr_src = _grow_tile(tk, ns_pad, _MAX_XFORM_ROWS)
    tr_tgt = _grow_tile(tm, nt_pad, _MAX_XFORM_ROWS)
    xw = _feature_transform(x_p, wl_p, b0_p, tr_src, jnp.bfloat16)   # (ns_pad, d_pad)
    xtw = _feature_transform(xt_p, wr_p, b_p, tr_tgt, jnp.float32)   # (nt_pad, d_pad)

    # --- stage 2: tiled A @ xw with K-axis accumulator + fused epilogue ---
    out_dtype = jnp.bfloat16 if activation == "relu" else jnp.float32
    grid = (nt_pad // tm, ns_pad // tk)
    flops = 2 * nt_pad * ns_pad * d_pad
    nbytes = (a_p.size + 2 * xw.size + 4 * xtw.size + 4 * inv_p.size
              + nt_pad * d_pad * jnp.dtype(out_dtype).itemsize)

    out = pl.pallas_call(
        functools.partial(_agg_kernel, activation=activation, valid_cols=dout),
        out_shape=jax.ShapeDtypeStruct((nt_pad, d_pad), out_dtype),
        grid=grid,
        in_specs=[
            pl.BlockSpec((tm, tk), lambda i, k: (i, k)),        # A counts (int8)
            pl.BlockSpec((tk, d_pad), lambda i, k: (k, 0)),     # x @ W_l      (bf16)
            pl.BlockSpec((tm, d_pad), lambda i, k: (i, 0)),     # x_t @ W_r + b (f32)
            pl.BlockSpec((tm, 1), lambda i, k: (i, 0)),         # 1/deg         (f32)
        ],
        out_specs=pl.BlockSpec((tm, d_pad), lambda i, k: (i, 0)),
        scratch_shapes=[pltpu.VMEM((tm, d_pad), jnp.float32)],
        compiler_params=pltpu.CompilerParams(
            dimension_semantics=("parallel", "arbitrary"),
            vmem_limit_bytes=_VMEM_LIMIT),
        cost_estimate=pl.CostEstimate(
            flops=int(flops),
            transcendentals=int(nt_pad * d_pad) if activation == "log_softmax" else 0,
            bytes_accessed=int(nbytes)),
    )(a_p, xw, xtw, inv_p)

    return out[:n_tgt, :dout]


# --------------------------------------------------------------------------
# Plain-JAX glue mirroring GraphSAGE.forward(x, adjs)
# --------------------------------------------------------------------------
def graphsage_forward(x, adjs, params):
    """2 SAGEConv layers (mean aggr) + relu between + final log_softmax."""
    num_layers = len(params)
    h = x
    for i, (edge_index, size) in enumerate(adjs):
        n_src, n_tgt = size
        h_src = h[:n_src]
        h_tgt = h[:n_tgt]
        w_l, w_r, b = params[i]
        activation = "relu" if i != num_layers - 1 else "log_softmax"
        h = sage_layer(edge_index, n_src, n_tgt, h_src, h_tgt, w_l, w_r, b,
                       activation)
        # dropout(p=0.0) is identity -> skipped
    return h


def _reference_forward(x, adjs, params):
    """Pure-JAX f32 reference for correctness checking."""
    num_layers = len(params)
    h = x
    for i, (edge_index, size) in enumerate(adjs):
        n_src, n_tgt = size
        h_src = h[:n_src].astype(jnp.float32)
        h_tgt = h[:n_tgt].astype(jnp.float32)
        src, dst = edge_index[0], edge_index[1]
        counts = jnp.zeros((n_tgt, n_src), jnp.float32).at[dst, src].add(1.0)
        deg = jnp.sum(counts, axis=1, keepdims=True)
        inv_deg = jnp.where(deg > 0, 1.0 / jnp.maximum(deg, 1.0), 0.0)
        w_l, w_r, b = params[i]
        out = ((counts * inv_deg) @ h_src) @ w_l + h_tgt @ w_r + b[None, :]
        if i != num_layers - 1:
            out = jnp.maximum(out, 0.0)
        else:
            out = jax.nn.log_softmax(out, axis=-1)
        h = out
    return h


if __name__ == "__main__":
    key = jax.random.PRNGKey(0)
    keys = jax.random.split(key, 10)

    # small synthetic neighbor-sampled subgraph (Reddit-style 2-hop sampling)
    in_ch, hid_ch, out_ch = 32, 64, 16
    n_total, n_hop1, batch = 64, 16, 8   # sampled nodes / hop-1 targets / batch

    x = jax.random.normal(keys[0], (n_total, in_ch), jnp.float32)

    # layer 0 adj: sources in [0, n_total) -> targets in [0, n_hop1)
    e0 = 128
    src0 = jax.random.randint(keys[1], (e0,), 0, n_total)
    dst0 = jax.random.randint(keys[2], (e0,), 0, n_hop1)
    # layer 1 adj: sources in [0, n_hop1) -> targets in [0, batch)
    e1 = 48
    src1 = jax.random.randint(keys[3], (e1,), 0, n_hop1)
    dst1 = jax.random.randint(keys[4], (e1,), 0, batch)

    adjs = [
        (jnp.stack([src0, dst0]), (n_total, n_hop1)),
        (jnp.stack([src1, dst1]), (n_hop1, batch)),
    ]

    # SAGEConv parameters: (W_l [in,out], W_r [in,out], b [out])
    def init_lin(k, din, dout):
        return jax.random.normal(k, (din, dout), jnp.float32) / jnp.sqrt(
            jnp.float32(din))

    params = [
        (init_lin(keys[5], in_ch, hid_ch),
         init_lin(keys[6], in_ch, hid_ch),
         jnp.zeros((hid_ch,), jnp.float32)),
        (init_lin(keys[7], hid_ch, out_ch),
         init_lin(keys[8], hid_ch, out_ch),
         jnp.zeros((out_ch,), jnp.float32)),
    ]

    out = graphsage_forward(x, adjs, params)
    out = jax.block_until_ready(out)

    assert out.shape == (batch, out_ch)
    assert out.dtype == jnp.float32
    ref = _reference_forward(x, adjs, params)
    # bf16 MXU inputs / bf16 hidden layer with f32 accumulation -> loose compare
    assert bool(jnp.allclose(out, ref, atol=5e-2, rtol=5e-2))
    # log_softmax rows must exponentiate-sum to 1 (normalization done in f32)
    assert bool(jnp.allclose(jnp.sum(jnp.exp(out), axis=-1), 1.0, atol=1e-3))

    print("KERNEL_OK")
</pallas_src>

<mosaic_0001>
module attributes {stable_mosaic.version = 11 : i64} {
  func.func @_xform_kernel(%arg0: i32, %arg1: memref<128x128xbf16, #tpu.memory_space<vmem>>, %arg2: memref<128x128xbf16, #tpu.memory_space<vmem>>, %arg3: memref<1x128xf32, #tpu.memory_space<vmem>>, %arg4: memref<128x128xbf16, #tpu.memory_space<vmem>>) attributes {dimension_semantics = [#tpu.dimension_semantics<parallel>], iteration_bounds = array<i64: 1>, scalar_prefetch = 0 : i64, scratch_operands = 0 : i64, tpu.core_type = #tpu.core_type<tc>, window_params = [{transform_indices = @transform_0, window_bounds = array<i64: 128, 128>}, {pipeline_mode = #tpu.pipeline_mode<synchronous>, transform_indices = @transform_1, window_bounds = array<i64: 128, 128>}, {pipeline_mode = #tpu.pipeline_mode<synchronous>, transform_indices = @transform_2, window_bounds = array<i64: 1, 128>}, {transform_indices = @transform_3, window_bounds = array<i64: 128, 128>}]} {
    %c0 = arith.constant 0 : index
    %c0_0 = arith.constant 0 : index
    %0 = vector.load %arg1[%c0, %c0_0] : memref<128x128xbf16, #tpu.memory_space<vmem>>, vector<128x128xbf16>
    %c0_1 = arith.constant 0 : index
    %c0_2 = arith.constant 0 : index
    %1 = vector.load %arg2[%c0_1, %c0_2] : memref<128x128xbf16, #tpu.memory_space<vmem>>, vector<128x128xbf16>
    %cst = arith.constant dense<0.000000e+00> : vector<128x128xf32>
    %2 = tpu.matmul %0, %1, %cst {dimension_numbers = #tpu.dot_dimension_numbers<[1], [0], [0], [1], [0, 0, 1, 1], [], []>} : vector<128x128xbf16>, vector<128x128xbf16>, vector<128x128xf32> -> vector<128x128xf32>
    %c0_3 = arith.constant 0 : index
    %c0_4 = arith.constant 0 : index
    %3 = vector.load %arg3[%c0_3, %c0_4] : memref<1x128xf32, #tpu.memory_space<vmem>>, vector<1x128xf32>
    %4 = vector.broadcast %3 : vector<1x128xf32> to vector<128x128xf32>
    %5 = arith.addf %2, %4 : vector<128x128xf32>
    %6 = arith.truncf %5 : vector<128x128xf32> to vector<128x128xbf16>
    %c0_5 = arith.constant 0 : index
    %c0_6 = arith.constant 0 : index
    %7 = vector.load %arg4[%c0_5, %c0_6] : memref<128x128xbf16, #tpu.memory_space<vmem>>, vector<128x128xbf16>
    tpu.vector_store %arg4[%c0_5, %c0_6], %6 {strides = array<i32>} : memref<128x128xbf16, #tpu.memory_space<vmem>>, vector<128x128xbf16>,
    return
  }
  func.func @transform_0(%arg0: i32) -> (i32, i32) {
    %c0_i32 = arith.constant 0 : i32
    %c0_i32_0 = arith.constant 0 : i32
    return %arg0, %c0_i32 : i32, i32
  }
  func.func @transform_1(%arg0: i32) -> (i32, i32) {
    %c0_i32 = arith.constant 0 : i32
    %c0_i32_0 = arith.constant 0 : i32
    %c0_i32_1 = arith.constant 0 : i32
    return %c0_i32, %c0_i32_0 : i32, i32
  }
  func.func @transform_2(%arg0: i32) -> (i32, i32) {
    %c0_i32 = arith.constant 0 : i32
    %c0_i32_0 = arith.constant 0 : i32
    %c0_i32_1 = arith.constant 0 : i32
    return %c0_i32, %c0_i32_0 : i32, i32
  }
  func.func @transform_3(%arg0: i32) -> (i32, i32) {
    %c0_i32 = arith.constant 0 : i32
    %c0_i32_0 = arith.constant 0 : i32
    return %arg0, %c0_i32 : i32, i32
  }
}

</mosaic_0001>

<bundles_post_ra>
// kernel: tpu_custom_call.1
= control target key start
LH: loop header
LB: loop body
LE: loop exit
PB: predicated region body
PF: predicated region fallthrough
CT: control target
= control target key end

     0   :  { %8 = vsyncpa [#allocation3], 0  ;;  %s667_s0 = inlined_call_operand.hbm [shape: bf16[128,128], index: 0, kind: input, shape index: {}]   ;;  %s668_s1 = inlined_call_operand.hbm [shape: bf16[128,128], index: 1, kind: input, shape index: {}]   ;;  %s669_s2 = inlined_call_operand.vmem [shape: f32[1,128], index: 2, kind: input, shape index: {}]   ;;  %s670_s3 = inlined_call_operand.hbm [shape: bf16[128,128], index: 3, kind: output, shape index: {}]  }
   0x1   :  { %9 = vsyncpa [#allocation6], 0 }
   0x2   :  { %10 = vsyncpa [#allocation4], 0  ;;  %s621_s12 = smov [#allocation2]  }
   0x3   :  { %s16_s13 = sshll.u32 %s621_s12, 4  ;;  %s17_s13 = int_to_ptr.vmem [resolvable:$true] %s16_s13 }
   0x4   :  { %s563_s14 = scalar_lea.vmem %s17_s13, 1024  ;;  %p568_p1 = scmp.lt.s32.totalorder %s17_s13, %s17_s13 }
   0x5   :  { %p564_p0 = scmp.ne.s32.totalorder %s17_s13, %s563_s14  ;;  %p569_p2 = scmp.lt.s32.totalorder %s563_s14, %s563_s14 }
   0x7   :  { %p570_p3 = por %p569_p2, %p568_p1 }
   0x9   :  { %p571_p4 = pnand %p570_p3, %p564_p0 }
   0xb   :  { %574 = shalt.err (!%p571_p4)
}
   0xc   :  { %s622_s15 = smov 64   ;;  %s623_s16 = smov 4  }
   0xd   :  { %22 = dma.hbm_to_vmem [thread:$0]  %s667_s0, 1024, %s17_s13, [#allocation3], %s622_s15, %s622_s15, %s623_s16  }
   0xe   :  { %s624_s19 = smov [#allocation5]  }
   0xf   :  { %s28_s20 = sshll.u32 %s624_s19, 4  ;;  %s29_s20 = int_to_ptr.vmem [resolvable:$true] %s28_s20 }
  0x10   :  { %s583_s21 = scalar_lea.vmem %s29_s20, 1024  ;;  %p588_p6 = scmp.lt.s32.totalorder %s29_s20, %s29_s20 }
  0x11   :  { %p584_p5 = scmp.ne.s32.totalorder %s29_s20, %s583_s21  ;;  %p589_p7 = scmp.lt.s32.totalorder %s583_s21, %s583_s21 }
  0x13   :  { %p590_p8 = por %p589_p7, %p588_p6 }
  0x15   :  { %p591_p9 = pnand %p590_p8, %p584_p5 }
  0x17   :  { %594 = shalt.err (!%p591_p9)
}
  0x18   :  { %34 = dma.hbm_to_vmem [thread:$0]  %s668_s1, 1024, %s29_s20, [#allocation6], %s622_s15, %s622_s15, %s623_s16  }
  0x19   :  { %615 = dma.done.wait [#allocation3], 1024  }
  0x1a   :  { %616 = vsyncadd [#allocation3], 4294966272 }
  0x1b   :  { %617 = dma.done.wait [#allocation6], 1024  }
  0x1c   :  { %618 = vsyncadd [#allocation6], 4294966272  ;;  %v539_v0 = vld [vmem:[#allocation5 + $0x38] sm:$0xff]   ;;  %v540_v1 = vld [vmem:[#allocation5 + $0x30] sm:$0xff]  }
  0x1d   :  { %486 = vmatprep.subr.bf16.mxu0 %v539_v0  ;;  %518 = vmatprep.subr.bf16.mxu1 %v539_v0  ;;  %v541_v2 = vld [vmem:[#allocation5 + $0x28] sm:$0xff]   ;;  %v542_v3 = vld [vmem:[#allocation5 + $0x20] sm:$0xff]   ;;  %v543_v6 = vld [vmem:[#allocation5 + $0x18] sm:$0xff]  }
  0x1e   :  { %487 = vmatpush3.bf16.msra.mxu0 %v539_v0  ;;  %526 = vmatpush3.bf16.msra.mxu1 %v539_v0  ;;  %v547_v4 = vld [vmem:[#allocation2] sm:$0xff]   ;;  %v544_v7 = vld [vmem:[#allocation5 + $0x10] sm:$0xff]   ;;  %v545_v8 = vld [vmem:[#allocation5 + $0x8] sm:$0xff]  }
  0x1f   :  { %488 = vmatprep.subr.bf16.mxu0 %v540_v1  ;;  %519 = vmatprep.subr.bf16.mxu1 %v540_v1  ;;  %v548_v5 = vld [vmem:[#allocation2 + $0x20] sm:$0xff]   ;;  %v549_v10 = vld [vmem:[#allocation2 + $0x8] sm:$0xff]   ;;  %v551_v12 = vld [vmem:[#allocation2 + $0x10] sm:$0xff]  }
  0x20   :  { %502 = vmatprep.mubr.bf16.mxu0 %v547_v4  ;;  %510 = vmatprep.mubr.bf16.mxu1 %v548_v5  ;;  %v546_v9 = vld [vmem:[#allocation5] sm:$0xff]   ;;  %v550_v11 = vld [vmem:[#allocation2 + $0x28] sm:$0xff]   ;;  %v552_v13 = vld [vmem:[#allocation2 + $0x30] sm:$0xff]  }
  0x21   :  { %v553_v14 = vld [vmem:[#allocation2 + $0x18] sm:$0xff]   ;;  %v374_v18 = vld [vmem:[%s669_s2] ss:$0 sm:$0xff]  ;;  %s625_s2 = smov [#allocation7]  }
  0x22   :  { %489 = vmatpush3.bf16.msra.mxu0 %v540_v1  ;;  %527 = vmatpush3.bf16.msra.mxu1 %v540_v1  ;;  %v554_v15 = vld [vmem:[#allocation2 + $0x38] sm:$0xff]   ;;  %s361_s24 = sshll.u32 %s625_s2, 4  ;;  %s362_s24 = int_to_ptr.vmem [resolvable:$true] %s361_s24 }
  0x23   :  { %490 = vmatprep.subr.bf16.mxu0 %v541_v2  ;;  %520 = vmatprep.subr.bf16.mxu1 %v541_v2  ;;  %s595_s25 = scalar_lea.vmem %s362_s24, 1024  ;;  %p600_p11 = scmp.lt.s32.totalorder %s362_s24, %s362_s24 }
  0x24   :  { %p596_p10 = scmp.ne.s32.totalorder %s362_s24, %s595_s25  ;;  %p601_p12 = scmp.lt.s32.totalorder %s595_s25, %s595_s25 }
  0x26   :  { %491 = vmatpush3.bf16.msra.mxu0 %v541_v2  ;;  %528 = vmatpush3.bf16.msra.mxu1 %v541_v2  ;;  %p602_p13 = por %p601_p12, %p600_p11 }
  0x27   :  { %492 = vmatprep.subr.bf16.mxu0 %v542_v3  ;;  %521 = vmatprep.subr.bf16.mxu1 %v542_v3 }
  0x28   :  { %p603_p0 = pnand %p602_p13, %p596_p10 }
  0x2a   :  { %493 = vmatpush3.bf16.msra.mxu0 %v542_v3  ;;  %529 = vmatpush3.bf16.msra.mxu1 %v542_v3 }
  0x2b   :  { %494 = vmatprep.subr.bf16.mxu0 %v543_v6  ;;  %522 = vmatprep.subr.bf16.mxu1 %v543_v6 }
  0x2e   :  { %495 = vmatpush3.bf16.msra.mxu0 %v543_v6  ;;  %530 = vmatpush3.bf16.msra.mxu1 %v543_v6 }
  0x2f   :  { %496 = vmatprep.subr.bf16.mxu0 %v544_v7  ;;  %523 = vmatprep.subr.bf16.mxu1 %v544_v7 }
  0x32   :  { %497 = vmatpush3.bf16.msra.mxu0 %v544_v7  ;;  %531 = vmatpush3.bf16.msra.mxu1 %v544_v7 }
  0x33   :  { %498 = vmatprep.subr.bf16.mxu0 %v545_v8  ;;  %524 = vmatprep.subr.bf16.mxu1 %v545_v8 }
  0x36   :  { %499 = vmatpush3.bf16.msra.mxu0 %v545_v8  ;;  %532 = vmatpush3.bf16.msra.mxu1 %v545_v8 }
  0x37   :  { %500 = vmatprep.subr.bf16.mxu0 %v546_v9  ;;  %525 = vmatprep.subr.bf16.mxu1 %v546_v9 }
  0x3a   :  { %501 = vmatpush3.bf16.msra.mxu0 %v546_v9  ;;  %533 = vmatpush3.bf16.msra.mxu1 %v546_v9 }
  0x3d   :  { %503 = vmatmul.mubr.bf16.vlgmr.msra.gmra.mxu0 %v549_v10  ;;  %511 = vmatmul.mubr.bf16.vlgmr.msra.gmra.mxu1 %v550_v11 }
  0x3e   :  { %506 = vmatprep.mubr.bf16.mxu0 %v551_v12  ;;  %514 = vmatprep.mubr.bf16.mxu1 %v552_v13 }
  0x45   :  { %507 = vmatmul.mubr.bf16.gmra.mxu0 %v553_v14  ;;  %515 = vmatmul.mubr.bf16.gmra.mxu1 %v554_v15 }
  0xfd   :  { %v504_v16 = vpop.f32.mrf.mxu0  ;;  %v512_v17 = vpop.f32.mrf.mxu1 }
  0xfe   :  { %v222_v23 = vadd.f32 %v504_v16, %v374_v18  ;;  %v254_v24 = vadd.f32 %v512_v17, %v374_v18 }
  0xff   :  { %v213_v19 = vpop.f32.mrf.mxu0  ;;  %v245_v20 = vpop.f32.mrf.mxu1 }
 0x100   :  { %v214_v27 = vadd.f32 %v374_v18, %v213_v19  ;;  %v246_v28 = vadd.f32 %v374_v18, %v245_v20 }
 0x101   :  { %v505_v21 = vpop.f32.mrf.mxu0  ;;  %v513_v22 = vpop.f32.mrf.mxu1 }
 0x102   :  { %v225_v25 = vadd.f32 %v505_v21, %v374_v18  ;;  %v257_v26 = vadd.f32 %v513_v22, %v374_v18 }
 0x103   :  { %v216_v29 = vpop.f32.mrf.mxu0  ;;  %v248_v30 = vpop.f32.mrf.mxu1 }
 0x104   :  { %v431_v31 = vpack.c.bf16 %v225_v25, %v222_v23  ;;  %v451_v32 = vpack.c.bf16 %v257_v26, %v254_v24  ;;  %v217_v33 = vadd.f32 %v374_v18, %v216_v29  ;;  %v249_v34 = vadd.f32 %v374_v18, %v248_v30 }
 0x105   :  { %v508_v35 = vpop.f32.mrf.mxu0  ;;  %v516_v36 = vpop.f32.mrf.mxu1 }
 0x106   :  { %463 = vst [vmem:[#allocation7 + $0x8] sm:$0xff] %v431_v31   ;;  %467 = vst [vmem:[#allocation7 + $0x28] sm:$0xff] %v451_v32   ;;  %v426_v37 = vpack.c.bf16 %v217_v33, %v214_v27  ;;  %v446_v38 = vpack.c.bf16 %v249_v34, %v246_v28  ;;  %v238_v43 = vadd.f32 %v508_v35, %v374_v18 }
 0x107   :  { %v229_v39 = vpop.f32.mrf.mxu0  ;;  %v261_v40 = vpop.f32.mrf.mxu1  ;;  %v270_v44 = vadd.f32 %v516_v36, %v374_v18 }
 0x108   :  { %427 = vst [vmem:[#allocation7] sm:$0xff] %v426_v37   ;;  %466 = vst [vmem:[#allocation7 + $0x20] sm:$0xff] %v446_v38   ;;  %v230_v47 = vadd.f32 %v374_v18, %v229_v39  ;;  %v262_v48 = vadd.f32 %v374_v18, %v261_v40 }
 0x109   :  { %v509_v41 = vpop.f32.mrf.mxu0  ;;  %v517_v42 = vpop.f32.mrf.mxu1 }
 0x10a   :  { %v241_v45 = vadd.f32 %v509_v41, %v374_v18  ;;  %v273_v46 = vadd.f32 %v517_v42, %v374_v18 }
 0x10b   :  { %v232_v49 = vpop.f32.mrf.mxu0  ;;  %v264_v50 = vpop.f32.mrf.mxu1 }
 0x10c   :  { %v441_v51 = vpack.c.bf16 %v241_v45, %v238_v43  ;;  %v461_v52 = vpack.c.bf16 %v273_v46, %v270_v44  ;;  %v233_v53 = vadd.f32 %v374_v18, %v232_v49  ;;  %v265_v54 = vadd.f32 %v374_v18, %v264_v50 }
 0x10e   :  { %465 = vst [vmem:[#allocation7 + $0x18] sm:$0xff] %v441_v51   ;;  %469 = vst [vmem:[#allocation7 + $0x38] sm:$0xff] %v461_v52   ;;  %v436_v55 = vpack.c.bf16 %v233_v53, %v230_v47  ;;  %v456_v56 = vpack.c.bf16 %v265_v54, %v262_v48 }
 0x110   :  { %464 = vst [vmem:[#allocation7 + $0x10] sm:$0xff] %v436_v55   ;;  %468 = vst [vmem:[#allocation7 + $0x30] sm:$0xff] %v456_v56  }
 0x111   :  { %606 = shalt.err (!%p603_p0)
}
 0x112   :  { %367 = dma.vmem_to_hbm [thread:$0]  %s362_s24, 1024, %s670_s3, [#allocation4], %s622_s15, %s622_s15, %s623_s16  }
 0x113   :  { %619 = dma.done.wait [#allocation4], 1024  }
 0x114   :  { %620 = vsyncadd [#allocation4], 4294966272 }
 0x115   :  { %371 = vsyncpa [#allocation3], 1 }
 0x116   :  { %372 = vsyncpa [#allocation6], 1 }
 0x117   :  { %373 = vsyncpa [#allocation4], 1 }

</bundles_post_ra>
